<compile_context>
chip_gen: v7x
topology: tpu7x:2x2x1
jax: 0.10.0
libtpu: 0.0.40
codegen_flags: <defaults>
</compile_context>

<pallas_src>
import functools
import math

import jax
import jax.numpy as jnp
from jax.experimental import pallas as pl
from jax.experimental.pallas import tpu as pltpu

_MIB = 1024 * 1024


def _round_up(x, m):
    return ((x + m - 1) // m) * m


def _chip_vmem_capacity():
    """Physical VMEM per core; conservative 64 MiB (v7x) fallback if unknown."""
    try:
        info = pltpu.get_tpu_info()
        cap = getattr(info, "vmem_capacity_bytes", None)
        if cap:
            return int(cap)
    except Exception:
        pass
    return 64 * _MIB


def _plan_tiling(d_model, dff, x_bytes, w_bytes, budget):
    """Pick (row tile, dff chunk) under a VMEM byte budget.

    Preference order:
      1. fully-resident weights (dff chunk == dff, nk == 1)  -> weights DMA'd once
      2. streamed weights with the largest 256-aligned chunk that fits
    """
    small = 4 * (dff + 3 * d_model) * 4 + 64 * 1024  # biases / gamma / beta / slack

    def io_bytes(tm_):
        # double-buffered x tile + double-buffered out tile + f32 accumulator
        return tm_ * d_model * (2 * x_bytes + 2 * x_bytes + 4)

    def wgt_bytes(dblk_):
        # W1 chunk + W2 chunk, assume double-buffered
        return 2 * 2 * d_model * dblk_ * w_bytes

    for tm_ in (512, 256, 128, 64, 32, 16, 8):
        if wgt_bytes(dff) + io_bytes(tm_) + small <= budget:
            return tm_, dff                      # resident weights
    for tm_ in (512, 256, 128, 64):
        for dblk_ in (2048, 1024, 512, 256):
            if dblk_ >= dff:
                continue
            if wgt_bytes(dblk_) + io_bytes(tm_) + small <= budget:
                return tm_, dblk_                # streamed weight chunks
    return 64, 256                               # last resort


def ffn_kernel(x_ref, w1_ref, b1_ref, w2_ref, b2_ref, gamma_ref, beta_ref,
               o_ref, acc_ref, *, eps, x_cast):
    j = pl.program_id(1)  # dff-chunk (reduction) axis

    @pl.when(j == 0)
    def _init():
        # Seed the accumulator with residual + linear2 bias so the serialized
        # finalize tail is LayerNorm only (the two adds hide under the first
        # chunk's DMA/MXU work).
        acc_ref[...] = (x_ref[...].astype(jnp.float32)
                        + b2_ref[...].astype(jnp.float32))

    # linear1 chunk + relu. MXU operands in their native / requested compute
    # dtype; accumulation in f32.
    x = x_ref[...]
    if x_cast is not None:
        x = x.astype(x_cast)
    h = jnp.dot(x, w1_ref[...], preferred_element_type=jnp.float32)
    h = jnp.maximum(h + b1_ref[...].astype(jnp.float32), 0.0)

    # linear2 partial product for this dff chunk, accumulated in f32.
    acc_ref[...] += jnp.dot(h.astype(w2_ref.dtype), w2_ref[...],
                            preferred_element_type=jnp.float32)

    # Epilogue on the last dff chunk: LayerNorm + scale/shift (f32 math).
    @pl.when(j == pl.num_programs(1) - 1)
    def _finalize():
        t = acc_ref[...]
        mean = jnp.mean(t, axis=-1, keepdims=True)
        centered = t - mean
        var = jnp.mean(centered * centered, axis=-1, keepdims=True)
        normed = centered * jax.lax.rsqrt(var + eps)      # rsqrt -> EUP slot
        o_ref[...] = (normed * gamma_ref[...].astype(jnp.float32)
                      + beta_ref[...].astype(jnp.float32)).astype(o_ref.dtype)


def ffn_layer_pallas(tgt, w1, b1, w2, b2, gamma, beta, *, eps=1e-5,
                     tm=None, dff_block=None, compute_dtype=None):
    """Fused FFN + residual + LayerNorm.  tgt: (..., d_model).

    tm / dff_block: optional overrides; by default they are planned from the
                    chip's VMEM capacity (weight residency preferred).
    compute_dtype:  optional MXU feed dtype (e.g. jnp.bfloat16 for f32 models).
    """
    orig_shape = tgt.shape
    d_model = orig_shape[-1]
    dff = w1.shape[1]
    x = tgt.reshape(-1, d_model)
    m = x.shape[0]

    # Optional reduced-precision MXU feed (f32 accumulation kept in-kernel).
    if compute_dtype is not None:
        w1 = w1.astype(compute_dtype)
        w2 = w2.astype(compute_dtype)
    x_cast = None
    if compute_dtype is not None and x.dtype != jnp.dtype(compute_dtype):
        x_cast = jnp.dtype(compute_dtype)

    x_bytes = jnp.dtype(x.dtype).itemsize
    w_bytes = jnp.dtype(w1.dtype).itemsize
    sub = {4: 8, 2: 16, 1: 32}.get(x_bytes, 8)      # sublane multiple per dtype

    cap = _chip_vmem_capacity()
    vmem_limit = int(min(cap * 7 // 8, 100 * _MIB))
    budget = max(vmem_limit - 8 * _MIB, 24 * _MIB)

    if tm is None or dff_block is None:
        tm_auto, dblk_auto = _plan_tiling(d_model, dff, x_bytes, w_bytes, budget)
        if tm is None:
            tm = tm_auto
        if dff_block is None:
            dff_block = dblk_auto

    # Row tile: don't exceed the input, keep it sublane-aligned.
    tm = min(tm, _round_up(m, sub))
    tm = max(sub, _round_up(tm, sub))
    # Megacore: keep >= 2 blocks on the "parallel" axis when there are enough
    # rows (v7x has 2 TensorCores; negligible cost on single-core chips).
    if m > 256 and -(-m // tm) == 1:
        tm = _round_up(-(-m // 2), sub)
    nm = -(-m // tm)                                 # ragged last block masked by Pallas

    # Hidden-axis chunking.  Resident (dblk == dff) needs no alignment; the
    # streamed path uses 128-aligned chunks and zero-pads dff once host-side.
    if dff_block >= dff:
        dblk = dff
        dff_pad = dff
    else:
        dblk = max(128, (dff_block // 128) * 128)
        dff_pad = _round_up(dff, dblk)
        if dff_pad != dff:
            pad = dff_pad - dff
            w1 = jnp.pad(w1, ((0, 0), (0, pad)))     # zero cols -> h == 0 there
            b1 = jnp.pad(b1, (0, pad))
            w2 = jnp.pad(w2, ((0, pad), (0, 0)))     # zero rows -> no contribution
    nk = dff_pad // dblk

    # biases / norm params as (1, C) 2-D so they broadcast cleanly in-kernel.
    b1_2d = b1.reshape(1, dff_pad)
    b2_2d = b2.reshape(1, d_model)
    gamma_2d = gamma.reshape(1, d_model)
    beta_2d = beta.reshape(1, d_model)

    out = pl.pallas_call(
        functools.partial(ffn_kernel, eps=eps, x_cast=x_cast),
        out_shape=jax.ShapeDtypeStruct((m, d_model), tgt.dtype),
        grid_spec=pltpu.PrefetchScalarGridSpec(
            num_scalar_prefetch=0,
            grid=(nm, nk),
            in_specs=[
                pl.BlockSpec((tm, d_model), lambda i, j: (i, 0)),    # x row tile
                pl.BlockSpec((d_model, dblk), lambda i, j: (0, j)),  # W1 chunk
                pl.BlockSpec((1, dblk), lambda i, j: (0, j)),        # b1 chunk
                pl.BlockSpec((dblk, d_model), lambda i, j: (j, 0)),  # W2 chunk
                pl.BlockSpec((1, d_model), lambda i, j: (0, 0)),     # b2
                pl.BlockSpec((1, d_model), lambda i, j: (0, 0)),     # gamma
                pl.BlockSpec((1, d_model), lambda i, j: (0, 0)),     # beta
            ],
            out_specs=pl.BlockSpec((tm, d_model), lambda i, j: (i, 0)),
            scratch_shapes=[pltpu.VMEM((tm, d_model), jnp.float32)],  # y accumulator
        ),
        compiler_params=pltpu.CompilerParams(
            dimension_semantics=("parallel", "arbitrary"),
            vmem_limit_bytes=vmem_limit,
        ),
    )(x, w1, b1_2d, w2, b2_2d, gamma_2d, beta_2d)

    return out.reshape(orig_shape)


def init_params(key, d_model, dim_feedforward, dtype=jnp.float32):
    """Deterministic init matching FFNLayer._reset_parameters:
    - weights (dim>1): xavier_uniform_
    - Linear biases: default nn.Linear init, U(-1/sqrt(fan_in), 1/sqrt(fan_in))
    - LayerNorm: gamma=1, beta=0
    """
    k1, k2, k3, k4 = jax.random.split(key, 4)

    def xavier(k, fan_in, fan_out):
        bound = math.sqrt(6.0 / (fan_in + fan_out))
        return jax.random.uniform(k, (fan_in, fan_out), dtype,
                                  minval=-bound, maxval=bound)

    w1 = xavier(k1, d_model, dim_feedforward)
    w2 = xavier(k2, dim_feedforward, d_model)
    b1 = jax.random.uniform(k3, (dim_feedforward,), dtype,
                            minval=-1.0 / math.sqrt(d_model),
                            maxval=1.0 / math.sqrt(d_model))
    b2 = jax.random.uniform(k4, (d_model,), dtype,
                            minval=-1.0 / math.sqrt(dim_feedforward),
                            maxval=1.0 / math.sqrt(dim_feedforward))
    gamma = jnp.ones((d_model,), dtype)
    beta = jnp.zeros((d_model,), dtype)
    return w1, b1, w2, b2, gamma, beta


def ffn_layer_ref(tgt, w1, b1, w2, b2, gamma, beta, eps=1e-5):
    """Pure-JAX reference of forward_post (dropout=0)."""
    h = jnp.maximum(tgt @ w1 + b1, 0.0)
    tgt2 = h @ w2 + b2
    t = tgt + tgt2
    mean = jnp.mean(t, axis=-1, keepdims=True)
    var = jnp.mean((t - mean) ** 2, axis=-1, keepdims=True)
    return (t - mean) / jnp.sqrt(var + eps) * gamma + beta


if __name__ == "__main__":
    key = jax.random.PRNGKey(0)
    k_in1, k_p1, k_in2, k_p2 = jax.random.split(key, 4)

    # --- Test 1: small shapes consistent with the module: tgt (seq, batch, d_model).
    # Auto-planned tiling -> fully-resident weights, nk == 1.
    seq, batch, d_model, dff = 8, 2, 32, 64
    tgt = jax.random.normal(k_in1, (seq, batch, d_model), jnp.float32)
    params = init_params(k_p1, d_model, dff)

    out = jax.block_until_ready(ffn_layer_pallas(tgt, *params))
    ref = ffn_layer_ref(tgt, *params)
    assert out.shape == tgt.shape and out.dtype == tgt.dtype
    assert jnp.allclose(out, ref, atol=1e-5, rtol=1e-5), \
        float(jnp.max(jnp.abs(out - ref)))

    # --- Test 2: ragged row count + streamed dff chunks + ragged dff (weight
    # zero-padding path): exercises the accumulator grid axis, the masked
    # partial row block, and the host-side dff padding.
    seq2, batch2, d2, dff2 = 13, 3, 128, 320   # rows = 39, dff not a 128-chunk multiple
    tgt2 = jax.random.normal(k_in2, (seq2, batch2, d2), jnp.float32)
    params2 = init_params(k_p2, d2, dff2)

    out2 = jax.block_until_ready(
        ffn_layer_pallas(tgt2, *params2, tm=16, dff_block=128))
    ref2 = ffn_layer_ref(tgt2, *params2)
    assert out2.shape == tgt2.shape and out2.dtype == tgt2.dtype
    # looser tolerance: XLA's default f32 matmul precision on TPU may differ
    # slightly from the kernel's f32-accumulated MXU path.
    assert jnp.allclose(out2, ref2, atol=2e-2, rtol=2e-2), \
        float(jnp.max(jnp.abs(out2 - ref2)))

    # --- Test 3: opt-in bf16 MXU feed for an f32 model (f32 accumulation and
    # f32 residual/LayerNorm epilogue) -> generous accuracy gate.
    out3 = jax.block_until_ready(
        ffn_layer_pallas(tgt, *params, compute_dtype=jnp.bfloat16))
    assert out3.shape == tgt.shape and out3.dtype == tgt.dtype
    assert jnp.allclose(out3, ref, atol=1e-1, rtol=1e-1), \
        float(jnp.max(jnp.abs(out3 - ref)))

    print("KERNEL_OK")
</pallas_src>

<mosaic_0001>
module attributes {stable_mosaic.version = 11 : i64} {
  func.func @ffn_kernel(%arg0: i32, %arg1: i32, %arg2: memref<16x32xf32, #tpu.memory_space<vmem>>, %arg3: memref<32x64xf32, #tpu.memory_space<vmem>>, %arg4: memref<1x64xf32, #tpu.memory_space<vmem>>, %arg5: memref<64x32xf32, #tpu.memory_space<vmem>>, %arg6: memref<1x32xf32, #tpu.memory_space<vmem>>, %arg7: memref<1x32xf32, #tpu.memory_space<vmem>>, %arg8: memref<1x32xf32, #tpu.memory_space<vmem>>, %arg9: memref<16x32xf32, #tpu.memory_space<vmem>>, %arg10: memref<16x32xf32, #tpu.memory_space<vmem>>) attributes {dimension_semantics = [#tpu.dimension_semantics<parallel>, #tpu.dimension_semantics<arbitrary>], iteration_bounds = array<i64: 1, 1>, scalar_prefetch = 0 : i64, scratch_operands = 1 : i64, tpu.core_type = #tpu.core_type<tc>, window_params = [{transform_indices = @transform_0, window_bounds = array<i64: 16, 32>}, {transform_indices = @transform_1, window_bounds = array<i64: 32, 64>}, {transform_indices = @transform_2, window_bounds = array<i64: 1, 64>}, {transform_indices = @transform_3, window_bounds = array<i64: 64, 32>}, {pipeline_mode = #tpu.pipeline_mode<synchronous>, transform_indices = @transform_4, window_bounds = array<i64: 1, 32>}, {pipeline_mode = #tpu.pipeline_mode<synchronous>, transform_indices = @transform_5, window_bounds = array<i64: 1, 32>}, {pipeline_mode = #tpu.pipeline_mode<synchronous>, transform_indices = @transform_6, window_bounds = array<i64: 1, 32>}, {transform_indices = @transform_7, window_bounds = array<i64: 16, 32>}]} {
    %c0_i32 = arith.constant 0 : i32
    %0 = arith.cmpi eq, %arg1, %c0_i32 : i32
    %1 = arith.extui %0 : i1 to i32
    %c0_i32_0 = arith.constant 0 : i32
    %2 = arith.cmpi ne, %1, %c0_i32_0 : i32
    scf.if %2 {
      %c0_16 = arith.constant 0 : index
      %c0_17 = arith.constant 0 : index
      %19 = vector.load %arg2[%c0_16, %c0_17] : memref<16x32xf32, #tpu.memory_space<vmem>>, vector<16x32xf32>
      %c0_18 = arith.constant 0 : index
      %c0_19 = arith.constant 0 : index
      %20 = vector.load %arg6[%c0_18, %c0_19] : memref<1x32xf32, #tpu.memory_space<vmem>>, vector<1x32xf32>
      %21 = vector.broadcast %20 : vector<1x32xf32> to vector<16x32xf32>
      %22 = arith.addf %19, %21 : vector<16x32xf32>
      %c0_20 = arith.constant 0 : index
      %c0_21 = arith.constant 0 : index
      %23 = vector.load %arg10[%c0_20, %c0_21] : memref<16x32xf32, #tpu.memory_space<vmem>>, vector<16x32xf32>
      tpu.vector_store %arg10[%c0_20, %c0_21], %22 {strides = array<i32>} : memref<16x32xf32, #tpu.memory_space<vmem>>, vector<16x32xf32>,
    } else {
    }
    %c0 = arith.constant 0 : index
    %c0_1 = arith.constant 0 : index
    %3 = vector.load %arg2[%c0, %c0_1] : memref<16x32xf32, #tpu.memory_space<vmem>>, vector<16x32xf32>
    %c0_2 = arith.constant 0 : index
    %c0_3 = arith.constant 0 : index
    %4 = vector.load %arg3[%c0_2, %c0_3] : memref<32x64xf32, #tpu.memory_space<vmem>>, vector<32x64xf32>
    %cst = arith.constant dense<0.000000e+00> : vector<16x64xf32>
    %5 = tpu.matmul %3, %4, %cst {dimension_numbers = #tpu.dot_dimension_numbers<[1], [0], [0], [1], [0, 0, 1, 1], [], []>} : vector<16x32xf32>, vector<32x64xf32>, vector<16x64xf32> -> vector<16x64xf32>
    %c0_4 = arith.constant 0 : index
    %c0_5 = arith.constant 0 : index
    %6 = vector.load %arg4[%c0_4, %c0_5] : memref<1x64xf32, #tpu.memory_space<vmem>>, vector<1x64xf32>
    %7 = vector.broadcast %6 : vector<1x64xf32> to vector<16x64xf32>
    %8 = arith.addf %5, %7 : vector<16x64xf32>
    %cst_6 = arith.constant 0.000000e+00 : f32
    %9 = vector.broadcast %cst_6 : f32 to vector<16x64xf32>
    %10 = arith.maximumf %8, %9 : vector<16x64xf32>
    %c0_7 = arith.constant 0 : index
    %c0_8 = arith.constant 0 : index
    %11 = vector.load %arg10[%c0_7, %c0_8] : memref<16x32xf32, #tpu.memory_space<vmem>>, vector<16x32xf32>
    %c0_9 = arith.constant 0 : index
    %c0_10 = arith.constant 0 : index
    %12 = vector.load %arg5[%c0_9, %c0_10] : memref<64x32xf32, #tpu.memory_space<vmem>>, vector<64x32xf32>
    %cst_11 = arith.constant dense<0.000000e+00> : vector<16x32xf32>
    %13 = tpu.matmul %10, %12, %cst_11 {dimension_numbers = #tpu.dot_dimension_numbers<[1], [0], [0], [1], [0, 0, 1, 1], [], []>} : vector<16x64xf32>, vector<64x32xf32>, vector<16x32xf32> -> vector<16x32xf32>
    %14 = arith.addf %11, %13 : vector<16x32xf32>
    %c0_12 = arith.constant 0 : index
    %c0_13 = arith.constant 0 : index
    %15 = vector.load %arg10[%c0_12, %c0_13] : memref<16x32xf32, #tpu.memory_space<vmem>>, vector<16x32xf32>
    tpu.vector_store %arg10[%c0_12, %c0_13], %14 {strides = array<i32>} : memref<16x32xf32, #tpu.memory_space<vmem>>, vector<16x32xf32>,
    %c0_i32_14 = arith.constant 0 : i32
    %16 = arith.cmpi eq, %arg1, %c0_i32_14 : i32
    %17 = arith.extui %16 : i1 to i32
    %c0_i32_15 = arith.constant 0 : i32
    %18 = arith.cmpi ne, %17, %c0_i32_15 : i32
    scf.if %18 {
      %c0_16 = arith.constant 0 : index
      %c0_17 = arith.constant 0 : index
      %19 = vector.load %arg10[%c0_16, %c0_17] : memref<16x32xf32, #tpu.memory_space<vmem>>, vector<16x32xf32>
      %cst_18 = arith.constant dense<0.000000e+00> : vector<16xf32>
      %20 = vector.multi_reduction <add>, %19, %cst_18 [1] : vector<16x32xf32> to vector<16xf32>
      %21 = vector.shape_cast %20 : vector<16xf32> to vector<16x1xf32>
      %cst_19 = arith.constant 3.200000e+01 : f32
      %22 = vector.broadcast %cst_19 : f32 to vector<16x1xf32>
      %23 = arith.divf %21, %22 : vector<16x1xf32>
      %24 = vector.broadcast %23 : vector<16x1xf32> to vector<16x32xf32>
      %25 = arith.subf %19, %24 : vector<16x32xf32>
      %26 = arith.mulf %25, %25 : vector<16x32xf32>
      %cst_20 = arith.constant dense<0.000000e+00> : vector<16xf32>
      %27 = vector.multi_reduction <add>, %26, %cst_20 [1] : vector<16x32xf32> to vector<16xf32>
      %28 = vector.shape_cast %27 : vector<16xf32> to vector<16x1xf32>
      %cst_21 = arith.constant 3.200000e+01 : f32
      %29 = vector.broadcast %cst_21 : f32 to vector<16x1xf32>
      %30 = arith.divf %28, %29 : vector<16x1xf32>
      %cst_22 = arith.constant 9.99999974E-6 : f32
      %31 = vector.broadcast %cst_22 : f32 to vector<16x1xf32>
      %32 = arith.addf %30, %31 : vector<16x1xf32>
      %33 = math.rsqrt %32 : vector<16x1xf32>
      %34 = vector.broadcast %33 : vector<16x1xf32> to vector<16x32xf32>
      %35 = arith.mulf %25, %34 : vector<16x32xf32>
      %c0_23 = arith.constant 0 : index
      %c0_24 = arith.constant 0 : index
      %36 = vector.load %arg7[%c0_23, %c0_24] : memref<1x32xf32, #tpu.memory_space<vmem>>, vector<1x32xf32>
      %37 = vector.broadcast %36 : vector<1x32xf32> to vector<16x32xf32>
      %38 = arith.mulf %35, %37 : vector<16x32xf32>
      %c0_25 = arith.constant 0 : index
      %c0_26 = arith.constant 0 : index
      %39 = vector.load %arg8[%c0_25, %c0_26] : memref<1x32xf32, #tpu.memory_space<vmem>>, vector<1x32xf32>
      %40 = vector.broadcast %39 : vector<1x32xf32> to vector<16x32xf32>
      %41 = arith.addf %38, %40 : vector<16x32xf32>
      %c0_27 = arith.constant 0 : index
      %c0_28 = arith.constant 0 : index
      %42 = vector.load %arg9[%c0_27, %c0_28] : memref<16x32xf32, #tpu.memory_space<vmem>>, vector<16x32xf32>
      tpu.vector_store %arg9[%c0_27, %c0_28], %41 {strides = array<i32>} : memref<16x32xf32, #tpu.memory_space<vmem>>, vector<16x32xf32>,
    } else {
    }
    return
  }
  func.func @transform_0(%arg0: i32, %arg1: i32) -> (i32, i32) {
    %c0_i32 = arith.constant 0 : i32
    %c0_i32_0 = arith.constant 0 : i32
    return %arg0, %c0_i32 : i32, i32
  }
  func.func @transform_1(%arg0: i32, %arg1: i32) -> (i32, i32) {
    %c0_i32 = arith.constant 0 : i32
    %c0_i32_0 = arith.constant 0 : i32
    return %c0_i32, %arg1 : i32, i32
  }
  func.func @transform_2(%arg0: i32, %arg1: i32) -> (i32, i32) {
    %c0_i32 = arith.constant 0 : i32
    %c0_i32_0 = arith.constant 0 : i32
    return %c0_i32, %arg1 : i32, i32
  }
  func.func @transform_3(%arg0: i32, %arg1: i32) -> (i32, i32) {
    %c0_i32 = arith.constant 0 : i32
    %c0_i32_0 = arith.constant 0 : i32
    return %arg1, %c0_i32 : i32, i32
  }
  func.func @transform_4(%arg0: i32, %arg1: i32) -> (i32, i32) {
    %c0_i32 = arith.constant 0 : i32
    %c0_i32_0 = arith.constant 0 : i32
    %c0_i32_1 = arith.constant 0 : i32
    return %c0_i32, %c0_i32_0 : i32, i32
  }
  func.func @transform_5(%arg0: i32, %arg1: i32) -> (i32, i32) {
    %c0_i32 = arith.constant 0 : i32
    %c0_i32_0 = arith.constant 0 : i32
    %c0_i32_1 = arith.constant 0 : i32
    return %c0_i32, %c0_i32_0 : i32, i32
  }
  func.func @transform_6(%arg0: i32, %arg1: i32) -> (i32, i32) {
    %c0_i32 = arith.constant 0 : i32
    %c0_i32_0 = arith.constant 0 : i32
    %c0_i32_1 = arith.constant 0 : i32
    return %c0_i32, %c0_i32_0 : i32, i32
  }
  func.func @transform_7(%arg0: i32, %arg1: i32) -> (i32, i32) {
    %c0_i32 = arith.constant 0 : i32
    %c0_i32_0 = arith.constant 0 : i32
    return %arg0, %c0_i32 : i32, i32
  }
}

</mosaic_0001>

<bundles_post_ra>
// kernel: tpu_custom_call.1
= control target key start
LH: loop header
LB: loop body
LE: loop exit
PB: predicated region body
PF: predicated region fallthrough
CT: control target
= control target key end

     0   :  { %vm42_vm0 = vcmask 261120   ;;  %s536_s0 = inlined_call_operand.vmem [shape: f32[16,32], index: 0, kind: input, shape index: {}]   ;;  %s537_s1 = inlined_call_operand.vmem [shape: f32[32,64], index: 1, kind: input, shape index: {}]   ;;  %s538_s2 = inlined_call_operand.vmem [shape: f32[1,64], index: 2, kind: input, shape index: {}]   ;;  %s539_s3 = inlined_call_operand.vmem [shape: f32[64,32], index: 3, kind: input, shape index: {}]   ;;  %s540_s4 = inlined_call_operand.vmem [shape: f32[1,32], index: 4, kind: input, shape index: {}]   ;;  %s541_s5 = inlined_call_operand.vmem [shape: f32[1,32], index: 5, kind: input, shape index: {}]   ;;  %s542_s6 = inlined_call_operand.vmem [shape: f32[1,32], index: 6, kind: input, shape index: {}]   ;;  %s543_s7 = inlined_call_operand.hbm [shape: f32[16,32], index: 7, kind: output, shape index: {}]  }
   0x1   :  { %v47_v0 = vld [vmem:[%s537_s1] sm:$0xff]  ;;  %v48_v1 = vld [vmem:[%s537_s1 + $0x8] sm:$0xff]  ;;  %v49_v2 = vld [vmem:[%s537_s1 + $0x10] sm:$0xff] }
   0x2   :  { %v360_v3 = vpack.c.bf16 %v48_v1, %v47_v0  ;;  %v50_v4 = vld [vmem:[%s537_s1 + $0x18] sm:$0xff]  ;;  %v45_v5 = vld [vmem:[%s536_s0] sm:$0xff]  ;;  %v145_v8 = vld [vmem:[%s539_s3 + $0x8] sm:$0xff] }
   0x3   :  { %v364_v6 = vpack.c.bf16 %v50_v4, %v49_v2  ;;  %338 = vmatprep.mubr.msk.f32.mxu0 %vm42_vm0, %v45_v5  ;;  %v144_v7 = vld [vmem:[%s539_s3] sm:$0xff]  ;;  %v146_v9 = vld [vmem:[%s539_s3 + $0x10] sm:$0xff]  ;;  %v147_v11 = vld [vmem:[%s539_s3 + $0x18] sm:$0xff] }
   0x4   :  { %361 = vmatprep.subr.bf16.mxu0 %v360_v3  ;;  %v368_v10 = vpack.c.bf16 %v145_v8, %v144_v7  ;;  %v372_v12 = vpack.c.bf16 %v147_v11, %v146_v9  ;;  %v148_v13 = vld [vmem:[%s539_s3 + $0x20] sm:$0xff]  ;;  %v149_v14 = vld [vmem:[%s539_s3 + $0x28] sm:$0xff] }
   0x5   :  { %363 = vmatpush3.bf16.msra.mxu0 %v360_v3 }
   0x6   :  { %12 = vsyncpa [#allocation4], 0  ;;  %365 = vmatprep.subr.bf16.mxu0 %v364_v6  ;;  %369 = vmatprep.subr.bf16.mxu1 %v368_v10  ;;  %v376_v15 = vpack.c.bf16 %v149_v14, %v148_v13  ;;  %v46_v16 = vld [vmem:[%s536_s0 + $0x8] sm:$0xff]  ;;  %v150_v17 = vld [vmem:[%s539_s3 + $0x30] sm:$0xff]  ;;  %vm152_vm1 = vcmask 523264   ;;  %s415_s9 = smov [#allocation3]  }
   0x7   :  { %371 = vmatpush3.bf16.msra.mxu1 %v368_v10  ;;  %v151_v18 = vld [vmem:[%s539_s3 + $0x38] sm:$0xff]  ;;  %v306_v20 = vld [vmem:[%s540_s4] ss:$0 sm:$0xff]  ;;  %s295_s10 = sshll.u32 %s415_s9, 4  ;;  %s296_s10 = int_to_ptr.vmem [resolvable:$true] %s295_s10 }
   0x8   :  { %373 = vmatprep.subr.bf16.mxu1 %v372_v12  ;;  %v380_v19 = vpack.c.bf16 %v151_v18, %v150_v17  ;;  %v41_v21 = vadd.f32 %v306_v20, %v46_v16  ;;  %v307_v22 = vld [vmem:[%s538_s2] ss:$0 sm:$0xff]  ;;  %v40_v29 = vadd.f32 %v306_v20, %v45_v5  ;;  %s391_s11 = scalar_lea.vmem %s296_s10, 256  ;;  %p396_p1 = scmp.lt.s32.totalorder %s296_s10, %s296_s10 }
   0x9   :  { %367 = vmatpush3.bf16.msra.mxu0 %v364_v6  ;;  %v312_v57 = vld [vmem:[%s541_s5] ss:$0 sm:$0xff]  ;;  %p392_p0 = scmp.ne.s32.totalorder %s296_s10, %s391_s11  ;;  %p397_p2 = scmp.lt.s32.totalorder %s391_s11, %s391_s11 }
   0xa   :  { %44 = vst.msk [vmem:[#allocation2 + $0x8] sm:$0xff] %vm42_vm0, %v41_v21  ;;  %43 = vst.msk [vmem:[#allocation2] sm:$0xff] %vm42_vm0, %v40_v29  ;;  %v313_v59 = vld [vmem:[%s542_s6] ss:$0 sm:$0xff] }
   0xb   :  { %375 = vmatpush3.bf16.msra.mxu1 %v372_v12  ;;  %p398_p3 = por %p397_p2, %p396_p1 }
   0xc   :  { %339 = vmatmul.mubr.msk.f32.vlgmr.msra.gmra.mrb[0].mxu0 %vm42_vm0, %v46_v16  ;;  %377 = vmatprep.subr.bf16.mxu1 %v376_v15 }
   0xd   :  { %p399_p4 = pnand %p398_p3, %p392_p0 }
   0xf   :  { %379 = vmatpush3.bf16.msra.mxu1 %v376_v15 }
  0x10   :  { %381 = vmatprep.subr.bf16.mxu1 %v380_v19 }
  0x11   :  { %v143_v30 = vld [vmem:[#allocation2 + $0x8] sm:$0xff]  ;;  %v142_v31 = vld [vmem:[#allocation2] sm:$0xff] }
  0x13   :  { %383 = vmatpush3.bf16.msra.mxu1 %v380_v19 }
  0xdf   :  { %v340_v23 = vpop.f32.mrb[0].mxu0 }
  0xe0   :  { %v137_v24 = vadd.f32 %v340_v23, %v307_v22  ;;  %v131_v25 = vpop.f32.mrb[1].mxu0 }
  0xe1   :  { %v132_v26 = vadd.f32 %v307_v22, %v131_v25 }
  0xe2   :  { %v141_v28 = vmax.f32 %v137_v24, 0.0 }
  0xe3   :  { %v140_v27 = vmax.f32 %v132_v26, 0.0 }
  0xe5   :  { %357 = vmatprep.mubr.msk.f32.mxu1 %vm152_vm1, %v140_v27 }
  0xe6   :  { %358 = vmatmul.mubr.msk.f32.vlgmr.msra.gmra.mrb[0].mxu1 %vm152_vm1, %v141_v28 }
 0x1b9   :  { %v359_v32 = vpop.f32.mrb[0].mxu1 }
 0x1ba   :  { %v235_v33 = vadd.f32 %v359_v32, %v143_v30  ;;  %v225_v34 = vpop.f32.mrb[1].mxu1 }
 0x1bb   :  { %v234_v35 = vadd.f32 %v225_v34, %v142_v31 }
 0x1bc   :  { %237 = vst.msk [vmem:[#allocation2 + $0x8] sm:$0xff] %vm42_vm0, %v235_v33 }
 0x1bd   :  { %236 = vst.msk [vmem:[#allocation2] sm:$0xff] %vm42_vm0, %v234_v35 }
 0x1c3   :  { %v242_v38 = vld [vmem:[#allocation2 + $0x8] sm:$0xff] }
 0x1c4   :  { %v241_v36 = vld [vmem:[#allocation2] sm:$0xff]  ;;  %v246_v39 = vsel %vm42_vm0, %v242_v38, 0.0 }
 0x1c5   :  { %v243_v37 = vsel %vm42_vm0, %v241_v36, 0.0 }
 0x1c6   :  { %244 = vadd.xlane.f32.xlu0 %v243_v37 }
 0x1ca   :  { %247 = vadd.xlane.f32.xlu0 %v246_v39 }
 0x253   :  { %v245_v40 = vpop.xlane.xlu0 %244 }
 0x254   :  { %v250_v41 = vmul.f32 0.03125, %v245_v40 }
 0x256   :  { %v252_v42 = vsub.f32 %v241_v36, %v250_v41 }
 0x257   :  { %v248_v43 = vpop.xlane.xlu0 %247 }
 0x258   :  { %v251_v44 = vmul.f32 0.03125, %v248_v43  ;;  %v254_v45 = vmul.f32 %v252_v42, %v252_v42 }
 0x25a   :  { %v253_v46 = vsub.f32 %v242_v38, %v251_v44  ;;  %v256_v47 = vsel %vm42_vm0, %v254_v45, 0.0 }
 0x25b   :  { %257 = vadd.xlane.f32.xlu1 %v256_v47 }
 0x25c   :  { %v255_v48 = vmul.f32 %v253_v46, %v253_v46 }
 0x25e   :  { %v259_v49 = vsel %vm42_vm0, %v255_v48, 0.0 }
 0x25f   :  { %260 = vadd.xlane.f32.xlu1 %v259_v49 }
 0x2e8   :  { %v258_v50 = vpop.xlane.xlu1 %257 }
 0x2e9   :  { %v262_v51 = vmul.f32 0.03125, %v258_v50 }
 0x2eb   :  { %v264_v52 = vadd.f32 1e-05, %v262_v51 }
 0x2ec   :  { %v261_v53 = vpop.xlane.xlu1 %260 }
 0x2ed   :  { %387 = vrsqrt.f32 %v264_v52  ;;  %v263_v54 = vmul.f32 0.03125, %v261_v53 }
 0x2ef   :  { %v265_v55 = vadd.f32 1e-05, %v263_v54 }
 0x2f1   :  { %389 = vrsqrt.f32 %v265_v55 }
 0x2f7   :  { %v388_v56 = vpop.eup %387 }
 0x2f8   :  { %v268_v58 = vmul.f32 %v388_v56, %v252_v42 }
 0x2fa   :  { %v277_v60 = vmul.f32 %v312_v57, %v268_v58 }
 0x2fb   :  { %v390_v61 = vpop.eup %389 }
 0x2fc   :  { %v269_v62 = vmul.f32 %v390_v61, %v253_v46  ;;  %v286_v63 = vadd.f32 %v313_v59, %v277_v60 }
 0x2fe   :  { %v278_v0 = vmul.f32 %v312_v57, %v269_v62  ;;  %288 = vst.msk [vmem:[#allocation3] sm:$0xff] %vm42_vm0, %v286_v63 }
 0x300   :  { %v287_v1 = vadd.f32 %v313_v59, %v278_v0 }
 0x302   :  { %289 = vst.msk [vmem:[#allocation3 + $0x8] sm:$0xff] %vm42_vm0, %v287_v1 }
 0x303   :  { %402 = shalt.err (!%p399_p4)
}
 0x304   :  { %s403_s12 = scalar_lea.hbm %s543_s7, 256 }
 0x305   :  { %p404_p5 = scmp.ne.s32.totalorder %s543_s7, %s403_s12  ;;  %p407_p6 = scmp.lt.u32.totalorder %s403_s12, %s543_s7 }
 0x307   :  { %p409_p7 = pnand %p407_p6, %p404_p5 }
 0x309   :  { %412 = shalt.err (!%p409_p7)
}
 0x30a   :  { %s416_s1 = smov 128   ;;  %s417_s17 = smov 8  }
 0x30b   :  { %301 = dma.vmem_to_hbm [thread:$0]  %s296_s10, 256, %s543_s7, [#allocation4], %s416_s1, %s416_s1, %s417_s17  }
 0x30c   :  { %413 = dma.done.wait [#allocation4], 256  }
 0x30d   :  { %414 = vsyncadd [#allocation4], 4294967040 }
 0x30e   :  { %305 = vsyncpa [#allocation4], 1 }

</bundles_post_ra>
